<compile_context>
chip_gen: v7x
topology: tpu7x:2x2x1
jax: 0.10.0
libtpu: 0.0.40
codegen_flags: <defaults>
</compile_context>

<pallas_src>
import math

import jax
import jax.numpy as jnp
from jax import lax
from jax.experimental import pallas as pl
from jax.experimental.pallas import tpu as pltpu


# ----------------------------- kernel body ---------------------------------


def _make_head_kernel(scale, bt, S):
    def head_kernel(x_ref, wq_ref, bq_ref, wk_ref, bk_ref, wv_ref, bv_ref,
                    attn_ref, scores_ref):
        D = wq_ref.shape[1]

        # x block arrives already flattened: (bt*S, E).
        x_bf = x_ref[...].astype(jnp.bfloat16)

        # One wide MXU matmul per projection, bf16 operands, f32 accumulate.
        q2 = jnp.dot(x_bf, wq_ref[...].astype(jnp.bfloat16),
                     preferred_element_type=jnp.float32) + bq_ref[...]
        k2 = jnp.dot(x_bf, wk_ref[...].astype(jnp.bfloat16),
                     preferred_element_type=jnp.float32) + bk_ref[...]
        v2 = jnp.dot(x_bf, wv_ref[...].astype(jnp.bfloat16),
                     preferred_element_type=jnp.float32) + bv_ref[...]

        # Sublane-split reshape (layout-compatible when S % 8 == 0).
        Q = q2.reshape(bt, S, D)
        K = k2.reshape(bt, S, D)
        V = v2.reshape(bt, S, D)

        # Batched Q.K^T via dot_general contracting the last dim of both
        # operands (no explicit transpose), bf16 operands, f32 accumulate.
        s = lax.dot_general(
            Q.astype(jnp.bfloat16), K.astype(jnp.bfloat16),
            dimension_numbers=(((2,), (2,)), ((0,), (0,))),
            preferred_element_type=jnp.float32) * scale          # (bt, S, S)

        # Numerically-stable softmax; reciprocal goes to the EUP slot.
        m = jnp.max(s, axis=-1, keepdims=True)
        p = jnp.exp(s - m)
        denom = jnp.sum(p, axis=-1, keepdims=True)
        p = p * pl.reciprocal(denom, approx=True)

        scores_ref[...] = p.astype(scores_ref.dtype)

        attn_ref[...] = lax.dot_general(
            p.astype(jnp.bfloat16), V.astype(jnp.bfloat16),
            dimension_numbers=(((2,), (1,)), ((0,), (0,))),
            preferred_element_type=jnp.float32).astype(attn_ref.dtype)

    return head_kernel


# --------------------------- sizing heuristics ------------------------------


def _rup(x, m):
    return ((x + m - 1) // m) * m


def _pad_elems(shape):
    """Element count after (8,128) sublane/lane padding of the last two dims."""
    s = list(shape)
    s[-1] = _rup(s[-1], 128)
    if len(s) >= 2:
        s[-2] = _rup(s[-2], 8)
    n = 1
    for d in s:
        n *= d
    return n


def _vmem_capacity_bytes():
    try:
        return int(pltpu.get_tpu_info().vmem_capacity_bytes)
    except Exception:
        return 64 << 20   # conservative: v7x per-TensorCore VMEM


def _is_v7x():
    try:
        return "v7" in jax.devices()[0].device_kind.lower()
    except Exception:
        return False


def _pick_batch_tile(B, S, E, D, scores_itemsize, budget, target_rows, max_bt):
    """Largest valid divisor of B whose padded block footprint fits `budget`,
    preferring bt*S >= target_rows so the projection M-dim is wide."""
    F32, BF16 = 4, 2

    def fits(bt):
        # double-buffered pipeline blocks (in + out + resident weights/biases)
        io = (_pad_elems((bt * S, E)) * F32
              + _pad_elems((bt, S, D)) * F32
              + _pad_elems((bt, S, S)) * scores_itemsize)
        wgt = 3 * (_pad_elems((E, D)) + _pad_elems((1, D))) * F32
        # live intermediates inside the body
        live = (_pad_elems((bt * S, E)) * BF16
                + 3 * _pad_elems((bt * S, D)) * (F32 + BF16)
                + 3 * _pad_elems((bt, S, D)) * (F32 + BF16)
                + 2 * _pad_elems((bt, S, S)) * F32
                + _pad_elems((bt, S, S)) * BF16)
        return 2 * (io + wgt) + live < budget

    bt = 1
    for cand in range(1, max_bt + 1):
        if B % cand != 0:
            continue
        # keep the flattened (bt*S, E) block (8,128)-legal
        if (cand * S) % 8 != 0 and cand != B:
            continue
        if not fits(cand):
            continue
        bt = cand
        if cand * S >= target_rows:
            break
    return bt


# ------------------------------- wrapper ------------------------------------


def head_forward(embeddings, params, scores_dtype=jnp.float32):
    """embeddings: (B, S, E). Returns (attention (B,S,D), attention_scores (B,S,S))."""
    B, S, E = embeddings.shape
    D = params["wq"].shape[1]
    scale = 1.0 / math.sqrt(D)

    vmem_cap = _vmem_capacity_bytes()
    vmem_limit = int(min(vmem_cap * 3 // 4, 96 << 20))
    budget = vmem_cap // 2

    # v7x has 2 TensorCores: keep at least 2 grid steps so the parallel axis
    # shards across both cores.
    max_bt = B
    if _is_v7x() and B > 1:
        max_bt = max(1, B // 2)

    scores_itemsize = jnp.dtype(scores_dtype).itemsize
    bt = _pick_batch_tile(B, S, E, D, scores_itemsize,
                          budget=budget, target_rows=512, max_bt=max_bt)
    grid = (B // bt,)

    # Flatten in the wrapper (free metadata op) so the kernel never relayouts x.
    x2d = embeddings.reshape(B * S, E)

    full2d = lambda b: (0, 0)

    attn, scores = pl.pallas_call(
        _make_head_kernel(scale, bt, S),
        out_shape=(jax.ShapeDtypeStruct((B, S, D), jnp.float32),
                   jax.ShapeDtypeStruct((B, S, S), scores_dtype)),
        grid_spec=pltpu.PrefetchScalarGridSpec(
            num_scalar_prefetch=0,
            grid=grid,
            in_specs=[
                pl.BlockSpec((bt * S, E), lambda b: (b, 0)),     # embeddings (flat)
                # Weights/biases: constant index_map -> already resident across
                # steps (Buffered(1) would reclaim the 2nd copy, but they are
                # tiny here, so default buffering is kept for compile safety).
                pl.BlockSpec((E, D), full2d),                    # WQ
                pl.BlockSpec((1, D), full2d),                    # bQ
                pl.BlockSpec((E, D), full2d),                    # WK
                pl.BlockSpec((1, D), full2d),                    # bK
                pl.BlockSpec((E, D), full2d),                    # WV
                pl.BlockSpec((1, D), full2d),                    # bV
            ],
            out_specs=(
                pl.BlockSpec((bt, S, D), lambda b: (b, 0, 0)),   # attention
                pl.BlockSpec((bt, S, S), lambda b: (b, 0, 0)),   # attention_scores
            ),
        ),
        compiler_params=pltpu.CompilerParams(
            dimension_semantics=("parallel",),
            vmem_limit_bytes=vmem_limit,
        ),
    )(x2d,
      params["wq"], params["bq"],
      params["wk"], params["bk"],
      params["wv"], params["bv"])
    return attn, scores


# ----------------------------- init / reference -----------------------------


def init_params(key, embed_dim, model_dim):
    """Deterministic init mimicking nn.Linear (uniform in +/- 1/sqrt(fan_in))."""
    ks = jax.random.split(key, 6)
    bound = 1.0 / math.sqrt(embed_dim)
    u = lambda k, shape: jax.random.uniform(k, shape, jnp.float32, -bound, bound)
    return {
        "wq": u(ks[0], (embed_dim, model_dim)),
        "bq": u(ks[1], (1, model_dim)),
        "wk": u(ks[2], (embed_dim, model_dim)),
        "bk": u(ks[3], (1, model_dim)),
        "wv": u(ks[4], (embed_dim, model_dim)),
        "bv": u(ks[5], (1, model_dim)),
    }


def reference(embeddings, params):
    D = params["wq"].shape[1]
    Q = embeddings @ params["wq"] + params["bq"]
    K = embeddings @ params["wk"] + params["bk"]
    V = embeddings @ params["wv"] + params["bv"]
    s = jnp.einsum("bqd,bkd->bqk", Q, K) / math.sqrt(D)
    p = jax.nn.softmax(s, axis=-1)
    return jnp.einsum("bqk,bkd->bqd", p, V), p


if __name__ == "__main__":
    # Small shapes consistent with the module: embed_dim=32, model_dim=8.
    B, S, E, D = 2, 8, 32, 8

    key = jax.random.PRNGKey(0)
    kx, kp = jax.random.split(key)
    embeddings = jax.random.normal(kx, (B, S, E), jnp.float32)
    params = init_params(kp, E, D)

    attn, scores = head_forward(embeddings, params)
    attn = jax.block_until_ready(attn)
    scores = jax.block_until_ready(scores)

    ref_attn, ref_scores = reference(embeddings, params)
    assert attn.shape == (B, S, D) and scores.shape == (B, S, S)
    # bf16 MXU operands (f32 accumulate) + approx EUP reciprocal -> slightly
    # relaxed tolerance vs. the pure-f32 reference.
    assert jnp.allclose(scores, ref_scores, atol=2e-2, rtol=2e-2), "scores mismatch"
    assert jnp.allclose(attn, ref_attn, atol=2e-2, rtol=2e-2), "attention mismatch"
    print("KERNEL_OK")
</pallas_src>

<mosaic_0001>
module attributes {stable_mosaic.version = 11 : i64} {
  func.func @head_kernel(%arg0: i32, %arg1: memref<16x32xf32, #tpu.memory_space<vmem>>, %arg2: memref<32x8xf32, #tpu.memory_space<vmem>>, %arg3: memref<1x8xf32, #tpu.memory_space<vmem>>, %arg4: memref<32x8xf32, #tpu.memory_space<vmem>>, %arg5: memref<1x8xf32, #tpu.memory_space<vmem>>, %arg6: memref<32x8xf32, #tpu.memory_space<vmem>>, %arg7: memref<1x8xf32, #tpu.memory_space<vmem>>, %arg8: memref<2x8x8xf32, #tpu.memory_space<vmem>>, %arg9: memref<2x8x8xf32, #tpu.memory_space<vmem>>) attributes {dimension_semantics = [#tpu.dimension_semantics<parallel>], iteration_bounds = array<i64: 1>, scalar_prefetch = 0 : i64, scratch_operands = 0 : i64, tpu.core_type = #tpu.core_type<tc>, window_params = [{transform_indices = @transform_0, window_bounds = array<i64: 16, 32>}, {pipeline_mode = #tpu.pipeline_mode<synchronous>, transform_indices = @transform_1, window_bounds = array<i64: 32, 8>}, {pipeline_mode = #tpu.pipeline_mode<synchronous>, transform_indices = @transform_2, window_bounds = array<i64: 1, 8>}, {pipeline_mode = #tpu.pipeline_mode<synchronous>, transform_indices = @transform_3, window_bounds = array<i64: 32, 8>}, {pipeline_mode = #tpu.pipeline_mode<synchronous>, transform_indices = @transform_4, window_bounds = array<i64: 1, 8>}, {pipeline_mode = #tpu.pipeline_mode<synchronous>, transform_indices = @transform_5, window_bounds = array<i64: 32, 8>}, {pipeline_mode = #tpu.pipeline_mode<synchronous>, transform_indices = @transform_6, window_bounds = array<i64: 1, 8>}, {transform_indices = @transform_7, window_bounds = array<i64: 2, 8, 8>}, {transform_indices = @transform_8, window_bounds = array<i64: 2, 8, 8>}]} {
    %c0 = arith.constant 0 : index
    %c0_0 = arith.constant 0 : index
    %0 = vector.load %arg1[%c0, %c0_0] : memref<16x32xf32, #tpu.memory_space<vmem>>, vector<16x32xf32>
    %1 = arith.truncf %0 : vector<16x32xf32> to vector<16x32xbf16>
    %c0_1 = arith.constant 0 : index
    %c0_2 = arith.constant 0 : index
    %2 = vector.load %arg2[%c0_1, %c0_2] : memref<32x8xf32, #tpu.memory_space<vmem>>, vector<32x8xf32>
    %3 = arith.truncf %2 : vector<32x8xf32> to vector<32x8xbf16>
    %cst = arith.constant dense<0.000000e+00> : vector<16x8xf32>
    %4 = tpu.matmul %1, %3, %cst {dimension_numbers = #tpu.dot_dimension_numbers<[1], [0], [0], [1], [0, 0, 1, 1], [], []>} : vector<16x32xbf16>, vector<32x8xbf16>, vector<16x8xf32> -> vector<16x8xf32>
    %c0_3 = arith.constant 0 : index
    %c0_4 = arith.constant 0 : index
    %5 = vector.load %arg3[%c0_3, %c0_4] : memref<1x8xf32, #tpu.memory_space<vmem>>, vector<1x8xf32>
    %6 = vector.broadcast %5 : vector<1x8xf32> to vector<16x8xf32>
    %7 = arith.addf %4, %6 : vector<16x8xf32>
    %c0_5 = arith.constant 0 : index
    %c0_6 = arith.constant 0 : index
    %8 = vector.load %arg4[%c0_5, %c0_6] : memref<32x8xf32, #tpu.memory_space<vmem>>, vector<32x8xf32>
    %9 = arith.truncf %8 : vector<32x8xf32> to vector<32x8xbf16>
    %cst_7 = arith.constant dense<0.000000e+00> : vector<16x8xf32>
    %10 = tpu.matmul %1, %9, %cst_7 {dimension_numbers = #tpu.dot_dimension_numbers<[1], [0], [0], [1], [0, 0, 1, 1], [], []>} : vector<16x32xbf16>, vector<32x8xbf16>, vector<16x8xf32> -> vector<16x8xf32>
    %c0_8 = arith.constant 0 : index
    %c0_9 = arith.constant 0 : index
    %11 = vector.load %arg5[%c0_8, %c0_9] : memref<1x8xf32, #tpu.memory_space<vmem>>, vector<1x8xf32>
    %12 = vector.broadcast %11 : vector<1x8xf32> to vector<16x8xf32>
    %13 = arith.addf %10, %12 : vector<16x8xf32>
    %c0_10 = arith.constant 0 : index
    %c0_11 = arith.constant 0 : index
    %14 = vector.load %arg6[%c0_10, %c0_11] : memref<32x8xf32, #tpu.memory_space<vmem>>, vector<32x8xf32>
    %15 = arith.truncf %14 : vector<32x8xf32> to vector<32x8xbf16>
    %cst_12 = arith.constant dense<0.000000e+00> : vector<16x8xf32>
    %16 = tpu.matmul %1, %15, %cst_12 {dimension_numbers = #tpu.dot_dimension_numbers<[1], [0], [0], [1], [0, 0, 1, 1], [], []>} : vector<16x32xbf16>, vector<32x8xbf16>, vector<16x8xf32> -> vector<16x8xf32>
    %c0_13 = arith.constant 0 : index
    %c0_14 = arith.constant 0 : index
    %17 = vector.load %arg7[%c0_13, %c0_14] : memref<1x8xf32, #tpu.memory_space<vmem>>, vector<1x8xf32>
    %18 = vector.broadcast %17 : vector<1x8xf32> to vector<16x8xf32>
    %19 = arith.addf %16, %18 : vector<16x8xf32>
    %20 = vector.shape_cast %7 : vector<16x8xf32> to vector<2x8x8xf32>
    %21 = vector.shape_cast %13 : vector<16x8xf32> to vector<2x8x8xf32>
    %22 = vector.shape_cast %19 : vector<16x8xf32> to vector<2x8x8xf32>
    %23 = arith.truncf %20 : vector<2x8x8xf32> to vector<2x8x8xbf16>
    %24 = arith.truncf %21 : vector<2x8x8xf32> to vector<2x8x8xbf16>
    %cst_15 = arith.constant dense<0.000000e+00> : vector<2x8x8xf32>
    %25 = tpu.matmul %23, %24, %cst_15 {dimension_numbers = #tpu.dot_dimension_numbers<[2], [2], [1], [1], [0, 0, 0, 1, 1, 1], [0], [0]>} : vector<2x8x8xbf16>, vector<2x8x8xbf16>, vector<2x8x8xf32> -> vector<2x8x8xf32>
    %cst_16 = arith.constant 0.353553385 : f32
    %26 = vector.broadcast %cst_16 : f32 to vector<2x8x8xf32>
    %27 = arith.mulf %25, %26 : vector<2x8x8xf32>
    %cst_17 = arith.constant dense<0xFF800000> : vector<2x8xf32>
    %28 = vector.multi_reduction <maximumf>, %27, %cst_17 [2] : vector<2x8x8xf32> to vector<2x8xf32>
    %29 = vector.shape_cast %28 : vector<2x8xf32> to vector<2x8x1xf32>
    %30 = vector.broadcast %29 : vector<2x8x1xf32> to vector<2x8x8xf32>
    %31 = arith.subf %27, %30 : vector<2x8x8xf32>
    %32 = math.exp %31 : vector<2x8x8xf32>
    %cst_18 = arith.constant dense<0.000000e+00> : vector<2x8xf32>
    %33 = vector.multi_reduction <add>, %32, %cst_18 [2] : vector<2x8x8xf32> to vector<2x8xf32>
    %34 = vector.shape_cast %33 : vector<2x8xf32> to vector<2x8x1xf32>
    %35 = tpu.reciprocal %34 {approx = true} : vector<2x8x1xf32> -> vector<2x8x1xf32>
    %36 = vector.broadcast %35 : vector<2x8x1xf32> to vector<2x8x8xf32>
    %37 = arith.mulf %32, %36 : vector<2x8x8xf32>
    %c0_19 = arith.constant 0 : index
    %c0_20 = arith.constant 0 : index
    %c0_21 = arith.constant 0 : index
    %38 = vector.load %arg9[%c0_19, %c0_20, %c0_21] : memref<2x8x8xf32, #tpu.memory_space<vmem>>, vector<2x8x8xf32>
    tpu.vector_store %arg9[%c0_19, %c0_20, %c0_21], %37 {strides = array<i32>} : memref<2x8x8xf32, #tpu.memory_space<vmem>>, vector<2x8x8xf32>,
    %39 = arith.truncf %37 : vector<2x8x8xf32> to vector<2x8x8xbf16>
    %40 = arith.truncf %22 : vector<2x8x8xf32> to vector<2x8x8xbf16>
    %cst_22 = arith.constant dense<0.000000e+00> : vector<2x8x8xf32>
    %41 = tpu.matmul %39, %40, %cst_22 {dimension_numbers = #tpu.dot_dimension_numbers<[2], [1], [1], [2], [0, 0, 0, 1, 1, 2], [0], [0]>} : vector<2x8x8xbf16>, vector<2x8x8xbf16>, vector<2x8x8xf32> -> vector<2x8x8xf32>
    %c0_23 = arith.constant 0 : index
    %c0_24 = arith.constant 0 : index
    %c0_25 = arith.constant 0 : index
    %42 = vector.load %arg8[%c0_23, %c0_24, %c0_25] : memref<2x8x8xf32, #tpu.memory_space<vmem>>, vector<2x8x8xf32>
    tpu.vector_store %arg8[%c0_23, %c0_24, %c0_25], %41 {strides = array<i32>} : memref<2x8x8xf32, #tpu.memory_space<vmem>>, vector<2x8x8xf32>,
    return
  }
  func.func @transform_0(%arg0: i32) -> (i32, i32) {
    %c0_i32 = arith.constant 0 : i32
    %c0_i32_0 = arith.constant 0 : i32
    return %arg0, %c0_i32 : i32, i32
  }
  func.func @transform_1(%arg0: i32) -> (i32, i32) {
    %c0_i32 = arith.constant 0 : i32
    %c0_i32_0 = arith.constant 0 : i32
    %c0_i32_1 = arith.constant 0 : i32
    return %c0_i32, %c0_i32_0 : i32, i32
  }
  func.func @transform_2(%arg0: i32) -> (i32, i32) {
    %c0_i32 = arith.constant 0 : i32
    %c0_i32_0 = arith.constant 0 : i32
    %c0_i32_1 = arith.constant 0 : i32
    return %c0_i32, %c0_i32_0 : i32, i32
  }
  func.func @transform_3(%arg0: i32) -> (i32, i32) {
    %c0_i32 = arith.constant 0 : i32
    %c0_i32_0 = arith.constant 0 : i32
    %c0_i32_1 = arith.constant 0 : i32
    return %c0_i32, %c0_i32_0 : i32, i32
  }
  func.func @transform_4(%arg0: i32) -> (i32, i32) {
    %c0_i32 = arith.constant 0 : i32
    %c0_i32_0 = arith.constant 0 : i32
    %c0_i32_1 = arith.constant 0 : i32
    return %c0_i32, %c0_i32_0 : i32, i32
  }
  func.func @transform_5(%arg0: i32) -> (i32, i32) {
    %c0_i32 = arith.constant 0 : i32
    %c0_i32_0 = arith.constant 0 : i32
    %c0_i32_1 = arith.constant 0 : i32
    return %c0_i32, %c0_i32_0 : i32, i32
  }
  func.func @transform_6(%arg0: i32) -> (i32, i32) {
    %c0_i32 = arith.constant 0 : i32
    %c0_i32_0 = arith.constant 0 : i32
    %c0_i32_1 = arith.constant 0 : i32
    return %c0_i32, %c0_i32_0 : i32, i32
  }
  func.func @transform_7(%arg0: i32) -> (i32, i32, i32) {
    %c0_i32 = arith.constant 0 : i32
    %c0_i32_0 = arith.constant 0 : i32
    %c0_i32_1 = arith.constant 0 : i32
    return %arg0, %c0_i32, %c0_i32_0 : i32, i32, i32
  }
  func.func @transform_8(%arg0: i32) -> (i32, i32, i32) {
    %c0_i32 = arith.constant 0 : i32
    %c0_i32_0 = arith.constant 0 : i32
    %c0_i32_1 = arith.constant 0 : i32
    return %arg0, %c0_i32, %c0_i32_0 : i32, i32, i32
  }
}

</mosaic_0001>

<bundles_post_ra>
// kernel: tpu_custom_call.1
= control target key start
LH: loop header
LB: loop body
LE: loop exit
PB: predicated region body
PF: predicated region fallthrough
CT: control target
= control target key end

     0   :  { %14 = vsyncpa [#allocation3], 0  ;;  %v591_v3 = vmov 0.0   ;;  %vm592_vm0 = vmmov 0   ;;  %s764_s0 = inlined_call_operand.vmem [shape: f32[16,32], index: 0, kind: input, shape index: {}]   ;;  %s765_s1 = inlined_call_operand.vmem [shape: f32[32,8], index: 1, kind: input, shape index: {}]   ;;  %s766_s2 = inlined_call_operand.vmem [shape: f32[1,8], index: 2, kind: input, shape index: {}]   ;;  %s767_s3 = inlined_call_operand.vmem [shape: f32[32,8], index: 3, kind: input, shape index: {}]   ;;  %s768_s4 = inlined_call_operand.vmem [shape: f32[1,8], index: 4, kind: input, shape index: {}]   ;;  %s769_s5 = inlined_call_operand.vmem [shape: f32[32,8], index: 5, kind: input, shape index: {}]   ;;  %s770_s6 = inlined_call_operand.vmem [shape: f32[1,8], index: 6, kind: input, shape index: {}]   ;;  %s771_s7 = inlined_call_operand.hbm [shape: f32[2,8,8], index: 7, kind: output, shape index: {0}]   ;;  %s772_s8 = inlined_call_operand.hbm [shape: f32[2,8,8], index: 8, kind: output, shape index: {1}]  }
   0x1   :  { %v92_v0 = vld [vmem:[%s767_s3] sm:$0xff]  ;;  %v93_v1 = vld [vmem:[%s767_s3 + $0x8] sm:$0xff]  ;;  %v94_v2 = vld [vmem:[%s767_s3 + $0x10] sm:$0xff]  ;;  %489 = vmatprep.subr.bf16.mxu1 %v591_v3  ;;  %481 = vmatprep.subr.bf16.mxu0 %v591_v3 }
   0x2   :  { %v96_v4 = vpack.c.bf16 %v93_v1, %v92_v0  ;;  %v95_v5 = vld [vmem:[%s767_s3 + $0x18] sm:$0xff]  ;;  %v34_v6 = vld [vmem:[%s765_s1] sm:$0xff]  ;;  %v35_v7 = vld [vmem:[%s765_s1 + $0x8] sm:$0xff]  ;;  %493 = vmatprep.mubr.msk.bf16.mxu1 %vm592_vm0, %v591_v3  ;;  %485 = vmatprep.mubr.msk.bf16.mxu0 %vm592_vm0, %v591_v3 }
   0x3   :  { %v38_v8 = vpack.c.bf16 %v35_v7, %v34_v6  ;;  %v36_v9 = vld [vmem:[%s765_s1 + $0x10] sm:$0xff]  ;;  %v97_v10 = vpack.c.bf16 %v95_v5, %v94_v2  ;;  %v31_v11 = vld [vmem:[%s764_s0] sm:$0xff]  ;;  %v32_v12 = vld [vmem:[%s764_s0 + $0x8] sm:$0xff] }
   0x4   :  { %490 = vmatpush3.bf16.msra.mxu1 %v96_v4  ;;  %v37_v13 = vld [vmem:[%s765_s1 + $0x18] sm:$0xff]  ;;  %v146_v15 = vld [vmem:[%s769_s5] sm:$0xff]  ;;  %v147_v16 = vld [vmem:[%s769_s5 + $0x8] sm:$0xff] }
   0x5   :  { %491 = vmatprep.subr.bf16.mxu1 %v591_v3  ;;  %482 = vmatpush3.bf16.msra.mxu0 %v38_v8  ;;  %v39_v14 = vpack.c.bf16 %v37_v13, %v36_v9 }
   0x6   :  { %483 = vmatprep.subr.bf16.mxu0 %v591_v3 }
   0x7   :  { %15 = vsyncpa [#allocation5], 0  ;;  %v33_v17 = vpack.c.bf16 %v32_v12, %v31_v11  ;;  %vm47_vm1 = vcmask 261120   ;;  %v150_v18 = vpack.c.bf16 %v147_v16, %v146_v15  ;;  %v148_v19 = vld [vmem:[%s769_s5 + $0x10] sm:$0xff]  ;;  %v149_v20 = vld [vmem:[%s769_s5 + $0x18] sm:$0xff]  ;;  %vm204_vm2 = vcmask 64512  }
   0x8   :  { %492 = vmatpush3.bf16.msra.mxu1 %v97_v10  ;;  %v151_v21 = vpack.c.bf16 %v149_v20, %v148_v19  ;;  %v456_v22 = vld [vmem:[%s768_s4] ss:$0 sm:$0xff]  ;;  %vm330_vm3 = vcmask 1043456  }
   0x9   :  { %484 = vmatpush3.bf16.msra.mxu0 %v39_v14  ;;  %505 = vmatprep.subr.bf16.mxu1 %v591_v3  ;;  %v454_v28 = vld [vmem:[%s766_s2] ss:$0 sm:$0xff]  ;;  %s593_s2 = smov [#allocation4]  }
   0xa   :  { %497 = vmatprep.subr.bf16.mxu0 %v591_v3  ;;  %v458_v39 = vld [vmem:[%s770_s6] ss:$0 sm:$0xff]  ;;  %s439_s6 = sshll.u32 %s593_s2, 4  ;;  %s440_s6 = int_to_ptr.vmem [resolvable:$true] %s439_s6 }
   0xb   :  { %494 = vmatmul.mubr.msk.bf16.vlgmr.msra.gmra.mrb[0].mxu1 %vm47_vm1, %v33_v17  ;;  %s543_s12 = scalar_lea.vmem %s440_s6, 256  ;;  %p548_p1 = scmp.lt.s32.totalorder %s440_s6, %s440_s6 }
   0xc   :  { %486 = vmatmul.mubr.msk.bf16.vlgmr.msra.gmra.mrb[0].mxu0 %vm47_vm1, %v33_v17  ;;  %507 = vmatprep.mubr.msk.bf16.mxu1 %vm592_vm0, %v591_v3  ;;  %p544_p0 = scmp.ne.s32.totalorder %s440_s6, %s543_s12  ;;  %p549_p2 = scmp.lt.s32.totalorder %s543_s12, %s543_s12 }
   0xd   :  { %498 = vmatpush3.bf16.msra.mxu0 %v150_v18  ;;  %501 = vmatprep.mubr.msk.bf16.mxu0 %vm592_vm0, %v591_v3 }
   0xe   :  { %499 = vmatprep.subr.bf16.mxu0 %v591_v3  ;;  %p550_p3 = por %p549_p2, %p548_p1 }
  0x10   :  { %p551_p4 = pnand %p550_p3, %p544_p0 }
  0x11   :  { %500 = vmatpush3.bf16.msra.mxu0 %v151_v21 }
  0x12   :  { %511 = vmatprep.subr.bf16.mxu0 %v591_v3 }
  0x14   :  { %502 = vmatmul.mubr.msk.bf16.vlgmr.msra.gmra.mrb[4].mxu0 %vm47_vm1, %v33_v17 }
  0x15   :  { %513 = vmatprep.mubr.msk.bf16.mxu0 %vm592_vm0, %v591_v3 }
  0xde   :  { %v139_v23 = vpop.f32.mrb[0].mxu1 }
  0xdf   :  { %v140_v24 = vadd.f32 %v456_v22, %v139_v23  ;;  %v495_v25 = vpop.f32.mrb[1].mxu1  ;;  %v85_v26 = vpop.f32.mrb[0].mxu0 }
  0xe0   :  { %v142_v27 = vpop.f32.mrb[2].mxu1  ;;  %v487_v29 = vpop.f32.mrb[1].mxu0  ;;  %v86_v37 = vadd.f32 %v454_v28, %v85_v26 }
  0xe1   :  { %v202_v30 = vpack.c.bf16 %v140_v24, %v140_v24  ;;  %v143_v31 = vadd.f32 %v456_v22, %v142_v27  ;;  %v496_v32 = vpop.f32.mrb[3].mxu1  ;;  %v88_v33 = vpop.f32.mrb[2].mxu0 }
  0xe2   :  { %v488_v34 = vpop.f32.mrb[3].mxu0  ;;  %v200_v40 = vpack.c.bf16 %v86_v37, %v86_v37  ;;  %v89_v41 = vadd.f32 %v454_v28, %v88_v33 }
  0xe3   :  { %v209_v35 = vsel %vm204_vm2, %v202_v30, 0  ;;  %v203_v36 = vpack.c.bf16 %v143_v31, %v143_v31 }
  0xe4   :  { %506 = vmatpush3.bf16.xpose.msra.mxu1 %v209_v35  ;;  %v201_v49 = vpack.c.bf16 %v89_v41, %v89_v41 }
  0xe5   :  { %v255_v38 = vsel %vm204_vm2, %v203_v36, 0  ;;  %517 = vmatprep.subr.bf16.mxu1 %v591_v3 }
  0xe6   :  { %512 = vmatpush3.bf16.xpose.msra.mxu0 %v255_v38 }
  0xe7   :  { %v193_v42 = vpop.f32.mrb[4].mxu0  ;;  %523 = vmatprep.subr.bf16.mxu0 %v591_v3 }
  0xe8   :  { %v194_v43 = vadd.f32 %v458_v39, %v193_v42  ;;  %v503_v44 = vpop.f32.mrb[5].mxu0 }
  0xe9   :  { %v196_v45 = vpop.f32.mrb[6].mxu0 }
  0xea   :  { %v325_v46 = vpack.c.bf16 %v194_v43, %v194_v43  ;;  %v197_v47 = vadd.f32 %v458_v39, %v196_v45  ;;  %v504_v48 = vpop.f32.mrb[7].mxu0 }
  0xeb   :  { %508 = vmatmul.mubr.msk.bf16.vlgmr.msra.gmra.mrb[4].mxu1 %vm204_vm2, %v200_v40 }
  0xec   :  { %v332_v50 = vsel %vm330_vm3, %v325_v46, 0  ;;  %v326_v51 = vpack.c.bf16 %v197_v47, %v197_v47  ;;  %519 = vmatprep.mubr.msk.bf16.mxu1 %vm592_vm0, %v591_v3 }
  0xed   :  { %514 = vmatmul.mubr.msk.bf16.vlgmr.msra.gmra.mrb[8].mxu0 %vm204_vm2, %v201_v49  ;;  %518 = vmatpush3.bf16.msra.mxu1 %v332_v50 }
  0xee   :  { %v378_v52 = vsel %vm330_vm3, %v326_v51, 0  ;;  %525 = vmatprep.mubr.msk.bf16.mxu0 %vm592_vm0, %v591_v3 }
  0xef   :  { %524 = vmatpush3.bf16.msra.mxu0 %v378_v52 }
 0x1be   :  { %v245_v53 = vpop.f32.mrb[4].mxu1 }
 0x1bf   :  { %v297_v54 = vmul.f32 0.35355338, %v245_v53  ;;  %v509_v55 = vpop.f32.mrb[5].mxu1 }
 0x1c0   :  { %v248_v56 = vpop.f32.mrb[6].mxu1  ;;  %v291_v57 = vpop.f32.mrb[8].mxu0 }
 0x1c1   :  { %v298_v58 = vmul.f32 0.35355338, %v291_v57  ;;  %v510_v59 = vpop.f32.mrb[7].mxu1  ;;  %v515_v60 = vpop.f32.mrb[9].mxu0  ;;  %v299_v61 = vsel %vm204_vm2, %v297_v54, -inf }
 0x1c2   :  { %300 = vmax.xlane.f32.xlu0 %v299_v61  ;;  %v294_v62 = vpop.f32.mrb[10].mxu0 }
 0x1c3   :  { %v516_v63 = vpop.f32.mrb[11].mxu0  ;;  %v302_v0 = vsel %vm204_vm2, %v298_v58, -inf }
 0x1c6   :  { %303 = vmax.xlane.f32.xlu0 %v302_v0 }
 0x24f   :  { %v301_v1 = vpop.xlane.xlu0 %300 }
 0x250   :  { %v305_v2 = vsub.f32 %v297_v54, %v301_v1 }
 0x252   :  { %v307_v3 = vmul.f32 1.442695, %v305_v2 }
 0x253   :  { %v304_v4 = vpop.xlane.xlu0 %303 }
 0x254   :  { %535 = vpow2.f32 %v307_v3  ;;  %v306_v5 = vsub.f32 %v298_v58, %v304_v4 }
 0x256   :  { %v309_v6 = vmul.f32 1.442695, %v306_v5 }
 0x258   :  { %537 = vpow2.f32 %v309_v6 }
 0x25e   :  { %v536_v7 = vpop.eup %535 }
 0x25f   :  { %v311_v8 = vsel %vm204_vm2, %v536_v7, 0.0 }
 0x260   :  { %312 = vadd.xlane.f32.xlu1 %v311_v8 }
 0x262   :  { %v538_v9 = vpop.eup %537 }
 0x263   :  { %v314_v10 = vsel %vm204_vm2, %v538_v9, 0.0 }
 0x264   :  { %315 = vadd.xlane.f32.xlu1 %v314_v10 }
 0x2ed   :  { %v313_v11 = vpop.xlane.xlu1 %312 }
 0x2ee   :  { %539 = vrcp.f32 %v313_v11 }
 0x2f1   :  { %v316_v12 = vpop.xlane.xlu1 %315 }
 0x2f2   :  { %541 = vrcp.f32 %v316_v12 }
 0x2f8   :  { %v540_v13 = vpop.eup %539 }
 0x2f9   :  { %v319_v14 = vmul.f32 %v540_v13, %v536_v7 }
 0x2fb   :  { %321 = vst.msk [vmem:[#allocation4] sm:$0xff] %vm204_vm2, %v319_v14  ;;  %v323_v15 = vpack.c.bf16 %v319_v14, %v319_v14 }
 0x2fc   :  { %v542_v16 = vpop.eup %541 }
 0x2fd   :  { %v320_v17 = vmul.f32 %v542_v16, %v538_v9  ;;  %520 = vmatmul.mubr.msk.bf16.vlgmr.msra.gmra.mrb[8].mxu1 %vm204_vm2, %v323_v15 }
 0x2ff   :  { %322 = vst.msk [vmem:[#allocation4 + $0x8] sm:$0xff] %vm204_vm2, %v320_v17  ;;  %v324_v18 = vpack.c.bf16 %v320_v17, %v320_v17 }
 0x301   :  { %526 = vmatmul.mubr.msk.bf16.vlgmr.msra.gmra.mrb[12].mxu0 %vm204_vm2, %v324_v18 }
 0x302   :  { %554 = shalt.err (!%p551_p4)
}
 0x303   :  { %s555_s15 = scalar_lea.hbm %s772_s8, 256 }
 0x304   :  { %p556_p5 = scmp.ne.s32.totalorder %s772_s8, %s555_s15  ;;  %p559_p6 = scmp.lt.u32.totalorder %s555_s15, %s772_s8 }
 0x306   :  { %p561_p7 = pnand %p559_p6, %p556_p5 }
 0x308   :  { %564 = shalt.err (!%p561_p7)
}
 0x309   :  { %s594_s19 = smov 128   ;;  %s595_s20 = smov 8  }
 0x30a   :  { %445 = dma.vmem_to_hbm [thread:$0]  %s440_s6, 256, %s772_s8, [#allocation5], %s594_s19, %s594_s19, %s595_s20  }
 0x30b   :  { %s596_s23 = smov [#allocation2]  }
 0x30c   :  { %s427_s24 = sshll.u32 %s596_s23, 4  ;;  %s428_s24 = int_to_ptr.vmem [resolvable:$true] %s427_s24 }
 0x30d   :  { %s565_s25 = scalar_lea.vmem %s428_s24, 256  ;;  %p570_p9 = scmp.lt.s32.totalorder %s428_s24, %s428_s24 }
 0x30e   :  { %p566_p8 = scmp.ne.s32.totalorder %s428_s24, %s565_s25  ;;  %p571_p10 = scmp.lt.s32.totalorder %s565_s25, %s565_s25 }
 0x310   :  { %p572_p11 = por %p571_p10, %p570_p9 }
 0x312   :  { %p573_p12 = pnand %p572_p11, %p566_p8 }
 0x3d0   :  { %v368_v19 = vpop.f32.mrb[8].mxu1 }
 0x3d1   :  { %420 = vst.msk [vmem:[#allocation2] sm:$0xff] %vm204_vm2, %v368_v19  ;;  %v521_v20 = vpop.f32.mrb[9].mxu1 }
 0x3d2   :  { %v371_v21 = vpop.f32.mrb[10].mxu1 }
 0x3d3   :  { %v522_v22 = vpop.f32.mrb[11].mxu1 }
 0x3d4   :  { %v414_v23 = vpop.f32.mrb[12].mxu0 }
 0x3d5   :  { %421 = vst.msk [vmem:[#allocation2 + $0x8] sm:$0xff] %vm204_vm2, %v414_v23  ;;  %v527_v24 = vpop.f32.mrb[13].mxu0 }
 0x3d6   :  { %v417_v25 = vpop.f32.mrb[14].mxu0 }
 0x3d7   :  { %576 = shalt.err (!%p573_p12)
}
 0x3d8   :  { %s577_s27 = scalar_lea.hbm %s771_s7, 256 }
 0x3d9   :  { %p578_p13 = scmp.ne.s32.totalorder %s771_s7, %s577_s27  ;;  %p581_p0 = scmp.lt.u32.totalorder %s577_s27, %s771_s7 }
 0x3db   :  { %p583_p1 = pnand %p581_p0, %p578_p13 }
 0x3dd   :  { %586 = shalt.err (!%p583_p1)
}
 0x3de   :  { %433 = dma.vmem_to_hbm [thread:$0]  %s428_s24, 256, %s771_s7, [#allocation3], %s594_s19, %s594_s19, %s595_s20   ;;  %v528_v26 = vpop.f32.mrb[15].mxu0 }
 0x3df   :  { %587 = dma.done.wait [#allocation3], 256  }
 0x3e0   :  { %588 = vsyncadd [#allocation3], 4294967040 }
 0x3e1   :  { %589 = dma.done.wait [#allocation5], 256  }
 0x3e2   :  { %590 = vsyncadd [#allocation5], 4294967040 }
 0x3e3   :  { %452 = vsyncpa [#allocation3], 1 }
 0x3e4   :  { %453 = vsyncpa [#allocation5], 1 }

</bundles_post_ra>
